<compile_context>
chip_gen: v7x
topology: tpu7x:2x2x1
jax: 0.10.0
libtpu: 0.0.40
codegen_flags: <defaults>
</compile_context>

<pallas_src>
import functools

import jax
import jax.numpy as jnp
from jax.experimental import pallas as pl
from jax.experimental.pallas import tpu as pltpu


def _round_up(x: int, m: int) -> int:
    return ((x + m - 1) // m) * m


def _var_cost_kernel(x_ref, w_ref, o_ref, *, m_size, l_size, tm, tl):
    i = pl.program_id(0)   # M-tile index ("parallel")
    j = pl.program_id(1)   # L-tile index ("arbitrary", carries the accumulator)

    @pl.when(j == 0)
    def _():
        o_ref[...] = jnp.zeros_like(o_ref)

    x = x_ref[...].astype(jnp.float32)                    # (TM, TL)

    # nansum semantics + masking of out-of-bounds tail rows/cols (tail masks
    # are only emitted when the static shape actually has a tail).
    valid = jnp.logical_not(jnp.isnan(x))
    if m_size % tm != 0:
        rows = jax.lax.broadcasted_iota(jnp.int32, (tm, tl), 0) + i * tm
        valid = jnp.logical_and(valid, rows < m_size)
    if l_size % tl != 0:
        cols = jax.lax.broadcasted_iota(jnp.int32, (tm, tl), 1) + j * tl
        valid = jnp.logical_and(valid, cols < l_size)
    x = jnp.where(valid, x, 0.0)

    w = w_ref[...].astype(jnp.float32)                    # (TM, 1) folded weights
    row_ss = jnp.sum(x * x, axis=-1, keepdims=True)       # one cross-lane reduce
    partial = jnp.sum(row_ss * w)                         # tiny sublane reduce
    o_ref[...] += partial                                  # broadcast into (1,8,128)


def model_var_cost(dy, std):
    """loss = normObs(dy, std) = nansum((dy / std[c])**2) / (B*H*W)."""
    B, C, H, W = dy.shape
    M, L = B * C, H * W

    # Lane-dense 2-D view: rows = (b, c), lanes = spatial. No padding copy.
    x2 = dy.reshape(M, L)

    # Tile sizing: ~2 MiB (f32-equivalent) blocks; lane axis capped at 2048
    # lanes, M-tile grown for small-L inputs. Reduction (L) axis is last.
    TL = min(_round_up(L, 128), 2048)
    target_bytes = 2 << 20
    tm_target = max(8, target_bytes // (TL * 4))
    TM = min(_round_up(M, 8), _round_up(tm_target, 8), 1024)
    NM = pl.cdiv(M, TM)
    NL = pl.cdiv(L, TL)
    Mp = NM * TM

    # Fold inverse-variance weighting and static normalization into per-row
    # weights (tiny array built from std; padded tail rows get weight 0).
    w_c = 1.0 / (std.astype(jnp.float32) ** 2) / float(B * H * W)   # (C,)
    w_row = jnp.tile(w_c, B)                                        # (M,)
    if Mp != M:
        w_row = jnp.pad(w_row, (0, Mp - M))
    w_row = w_row.reshape(Mp, 1)

    kernel = functools.partial(_var_cost_kernel, m_size=M, l_size=L, tm=TM, tl=TL)

    partials = pl.pallas_call(
        kernel,
        out_shape=jax.ShapeDtypeStruct((NM, 8, 128), jnp.float32),
        grid_spec=pltpu.PrefetchScalarGridSpec(
            num_scalar_prefetch=0,
            grid=(NM, NL),
            in_specs=[
                pl.BlockSpec((TM, TL), lambda i, j: (i, j)),   # dy tile
                pl.BlockSpec((TM, 1), lambda i, j: (i, 0)),    # per-row weights
            ],
            # One (8,128)-aligned partial-sum block per M-tile; resident
            # across the inner L loop, disjoint across M-tiles (race-free
            # under a parallel M axis / megacore).
            out_specs=pl.BlockSpec((1, 8, 128), lambda i, j: (i, 0, 0)),
        ),
        compiler_params=pltpu.CompilerParams(
            dimension_semantics=("parallel", "arbitrary")),
    )(x2, w_row)

    # Tiny final reduction over per-M-tile partials (each block holds the
    # same accumulated scalar in every slot; read slot [0, 0]).
    return jnp.sum(partials[:, 0, 0])


def model_var_cost_ref(dy, std):
    B, C, H, W = dy.shape
    dyf = jnp.nan_to_num(dy.astype(jnp.float32), nan=0.0)
    w = 1.0 / (std.astype(jnp.float32) ** 2)
    per_c = jnp.sum(dyf * dyf, axis=(0, 2, 3))
    return jnp.sum(per_c * w) / (B * H * W)


if __name__ == "__main__":
    B, C, H, W = 2, 4, 16, 16

    key = jax.random.PRNGKey(0)
    k_dy, k_std = jax.random.split(key)
    dy = jax.random.normal(k_dy, (B, C, H, W), dtype=jnp.float32)
    # Positive per-channel observation-error std.
    std = 0.5 + jax.random.uniform(k_std, (C,), dtype=jnp.float32)

    loss = model_var_cost(dy, std)
    loss = jax.block_until_ready(loss)

    ref = model_var_cost_ref(dy, std)
    assert loss.shape == ()
    assert jnp.allclose(loss, ref, atol=1e-5, rtol=1e-5), "mismatch vs reference"

    print("KERNEL_OK")
</pallas_src>

<mosaic_0001>
module attributes {stable_mosaic.version = 11 : i64} {
  func.func @_var_cost_kernel(%arg0: i32, %arg1: i32, %arg2: memref<8x256xf32, #tpu.memory_space<vmem>>, %arg3: memref<8x1xf32, #tpu.memory_space<vmem>>, %arg4: memref<1x8x128xf32, #tpu.memory_space<vmem>>) attributes {dimension_semantics = [#tpu.dimension_semantics<parallel>, #tpu.dimension_semantics<arbitrary>], iteration_bounds = array<i64: 1, 1>, scalar_prefetch = 0 : i64, scratch_operands = 0 : i64, tpu.core_type = #tpu.core_type<tc>, window_params = [{transform_indices = @transform_0, window_bounds = array<i64: 8, 256>}, {transform_indices = @transform_1, window_bounds = array<i64: 8, 1>}, {transform_indices = @transform_2, window_bounds = array<i64: 1, 8, 128>}]} {
    %c0_i32 = arith.constant 0 : i32
    %0 = arith.cmpi eq, %arg1, %c0_i32 : i32
    %1 = arith.extui %0 : i1 to i32
    %c0_i32_0 = arith.constant 0 : i32
    %2 = arith.cmpi ne, %1, %c0_i32_0 : i32
    scf.if %2 {
      %cst_13 = arith.constant 0.000000e+00 : f32
      %21 = vector.broadcast %cst_13 : f32 to vector<1x8x128xf32>
      %c0_14 = arith.constant 0 : index
      %c0_15 = arith.constant 0 : index
      %c0_16 = arith.constant 0 : index
      %22 = vector.load %arg4[%c0_14, %c0_15, %c0_16] : memref<1x8x128xf32, #tpu.memory_space<vmem>>, vector<1x8x128xf32>
      tpu.vector_store %arg4[%c0_14, %c0_15, %c0_16], %21 {strides = array<i32>} : memref<1x8x128xf32, #tpu.memory_space<vmem>>, vector<1x8x128xf32>,
    } else {
    }
    %c0 = arith.constant 0 : index
    %c0_1 = arith.constant 0 : index
    %3 = vector.load %arg2[%c0, %c0_1] : memref<8x256xf32, #tpu.memory_space<vmem>>, vector<8x256xf32>
    %4 = arith.cmpf one, %3, %3 : vector<8x256xf32>
    %cst = arith.constant dense<true> : vector<8x256xi1>
    %5 = arith.xori %4, %cst : vector<8x256xi1>
    %cst_2 = arith.constant 0.000000e+00 : f32
    %6 = vector.broadcast %cst_2 : f32 to vector<8x256xf32>
    %7 = arith.select %5, %3, %6 : vector<8x256xi1>, vector<8x256xf32>
    %c0_3 = arith.constant 0 : index
    %c0_4 = arith.constant 0 : index
    %8 = vector.load %arg3[%c0_3, %c0_4] : memref<8x1xf32, #tpu.memory_space<vmem>>, vector<8x1xf32>
    %9 = arith.mulf %7, %7 : vector<8x256xf32>
    %cst_5 = arith.constant dense<0.000000e+00> : vector<8xf32>
    %10 = vector.multi_reduction <add>, %9, %cst_5 [1] : vector<8x256xf32> to vector<8xf32>
    %11 = vector.shape_cast %10 : vector<8xf32> to vector<8x1xf32>
    %12 = arith.mulf %11, %8 : vector<8x1xf32>
    %13 = vector.shape_cast %12 : vector<8x1xf32> to vector<1x8x1xf32>
    %cst_6 = arith.constant dense<0.000000e+00> : vector<1xf32>
    %14 = vector.multi_reduction <add>, %13, %cst_6 [1, 2] : vector<1x8x1xf32> to vector<1xf32>
    %15 = vector.shape_cast %14 : vector<1xf32> to vector<1x1x1xf32>
    %16 = vector.extract %15[0, 0, 0] : f32 from vector<1x1x1xf32>
    %c0_7 = arith.constant 0 : index
    %c0_8 = arith.constant 0 : index
    %c0_9 = arith.constant 0 : index
    %17 = vector.load %arg4[%c0_7, %c0_8, %c0_9] : memref<1x8x128xf32, #tpu.memory_space<vmem>>, vector<1x8x128xf32>
    %18 = vector.broadcast %16 : f32 to vector<1x8x128xf32>
    %19 = arith.addf %17, %18 : vector<1x8x128xf32>
    %c0_10 = arith.constant 0 : index
    %c0_11 = arith.constant 0 : index
    %c0_12 = arith.constant 0 : index
    %20 = vector.load %arg4[%c0_10, %c0_11, %c0_12] : memref<1x8x128xf32, #tpu.memory_space<vmem>>, vector<1x8x128xf32>
    tpu.vector_store %arg4[%c0_10, %c0_11, %c0_12], %19 {strides = array<i32>} : memref<1x8x128xf32, #tpu.memory_space<vmem>>, vector<1x8x128xf32>,
    return
  }
  func.func @transform_0(%arg0: i32, %arg1: i32) -> (i32, i32) {
    %c0_i32 = arith.constant 0 : i32
    return %arg0, %arg1 : i32, i32
  }
  func.func @transform_1(%arg0: i32, %arg1: i32) -> (i32, i32) {
    %c0_i32 = arith.constant 0 : i32
    %c0_i32_0 = arith.constant 0 : i32
    return %arg0, %c0_i32 : i32, i32
  }
  func.func @transform_2(%arg0: i32, %arg1: i32) -> (i32, i32, i32) {
    %c0_i32 = arith.constant 0 : i32
    %c0_i32_0 = arith.constant 0 : i32
    %c0_i32_1 = arith.constant 0 : i32
    return %arg0, %c0_i32, %c0_i32_0 : i32, i32, i32
  }
}

</mosaic_0001>

<bundles_post_ra>
// kernel: tpu_custom_call.1
= control target key start
LH: loop header
LB: loop body
LE: loop exit
PB: predicated region body
PF: predicated region fallthrough
CT: control target
= control target key end

     0   :  { %7 = vsyncpa [#allocation3], 0  ;;  %s173_s0 = inlined_call_operand.hbm [shape: f32[8,256], index: 0, kind: input, shape index: {}]   ;;  %s174_s1 = inlined_call_operand.vmem [shape: f32[8,1], index: 1, kind: input, shape index: {}]   ;;  %s175_s2 = inlined_call_operand.hbm [shape: f32[1,8,128], index: 2, kind: output, shape index: {}]  }
   0x1   :  { %8 = vsyncpa [#allocation4], 0  ;;  %s128_s9 = smov [#allocation2]   ;;  %s80_s13 = scalar_lea.hbm %s173_s0, 256 }
   0x2   :  { %s15_s10 = sshll.u32 %s128_s9, 4  ;;  %p81_p0 = scmp.ne.s32.totalorder %s173_s0, %s80_s13  ;;  %s16_s10 = int_to_ptr.vmem [resolvable:$true] %s15_s10 }
   0x3   :  { %p84_p1 = scmp.lt.u32.totalorder %s80_s13, %s173_s0 }
   0x5   :  { %p86_p2 = pnand %p84_p1, %p81_p0 }
   0x7   :  { %89 = shalt.err (!%p86_p2)
}
   0x8   :  { %s90_s18 = scalar_lea.vmem %s16_s10, 256  ;;  %p95_p4 = scmp.lt.s32.totalorder %s16_s10, %s16_s10 }
   0x9   :  { %p91_p3 = scmp.ne.s32.totalorder %s16_s10, %s90_s18  ;;  %p96_p5 = scmp.lt.s32.totalorder %s90_s18, %s90_s18 }
   0xb   :  { %p97_p6 = por %p96_p5, %p95_p4 }
   0xd   :  { %p98_p7 = pnand %p97_p6, %p91_p3 }
   0xf   :  { %101 = shalt.err (!%p98_p7)
}
  0x10   :  { %18 = dma.hbm_to_vmem [thread:$0]  %s173_s0, 256, %s16_s10, [#allocation3]  }
  0x11   :  { %124 = dma.done.wait [#allocation3], 256  }
  0x12   :  { %125 = vsyncadd [#allocation3], 4294967040  ;;  %v29_v0 = vld [vmem:[#allocation2] sm:$0xff]  ;;  %v30_v1 = vld [vmem:[#allocation2 + $0x8] sm:$0xff]  ;;  %vm129_vm2 = vmmov 1   ;;  %vm44_vm5 = vcmask 7168  }
  0x13   :  { %vm31_vm0 = vcmp.ne.f32.partialorder %v29_v0, %v29_v0  ;;  %vm32_vm1 = vcmp.ne.f32.partialorder %v30_v1, %v30_v1  ;;  %v37_v7 = vld [vmem:[%s174_s1] sm:$0xff]  ;;  %s130_s0 = smov [#allocation5]  }
  0x14   :  { %vm33_vm3 = vmxor %vm31_vm0, %vm129_vm2  ;;  %s65_s23 = sshll.u32 %s130_s0, 4  ;;  %s66_s23 = int_to_ptr.vmem [resolvable:$true] %s65_s23 }
  0x15   :  { %vm34_vm4 = vmxor %vm32_vm1, %vm129_vm2  ;;  %v35_v2 = vsel %vm33_vm3, %v29_v0, 0.0  ;;  %s102_s1 = scalar_lea.vmem %s66_s23, 128  ;;  %p107_p9 = scmp.lt.s32.totalorder %s66_s23, %s66_s23 }
  0x16   :  { %v36_v3 = vsel %vm34_vm4, %v30_v1, 0.0  ;;  %v38_v4 = vmul.f32 %v35_v2, %v35_v2  ;;  %p103_p8 = scmp.ne.s32.totalorder %s66_s23, %s102_s1  ;;  %p108_p10 = scmp.lt.s32.totalorder %s102_s1, %s102_s1 }
  0x17   :  { %v39_v5 = vmul.f32 %v36_v3, %v36_v3 }
  0x18   :  { %p109_p11 = por %p108_p10, %p107_p9 }
  0x19   :  { %v40_v6 = vadd.f32 %v39_v5, %v38_v4 }
  0x1a   :  { %p110_p12 = pnand %p109_p11, %p103_p8 }
  0x1b   :  { %41 = vadd.xlane.f32.xlu0 %v40_v6 }
  0xa8   :  { %v42_v8 = vpop.xlane.xlu0 %41 }
  0xa9   :  { %v43_v9 = vmul.f32 %v42_v8, %v37_v7 }
  0xab   :  { %v45_v10 = vsel %vm44_vm5, %v43_v9, 0.0 }
  0xac   :  { %46 = vadd.xlane.f32.xlu0 %v45_v10 }
 0x139   :  { %v47_v11 = vpop.xlane.xlu0 %46 }
 0x13a   :  { %v48_v12 = vrot.slane %v47_v11, 4 }
 0x13c   :  { %v49_v13 = vadd.f32 %v48_v12, %v47_v11 }
 0x13e   :  { %v50_v14 = vrot.slane %v49_v13, 2 }
 0x140   :  { %v51_v15 = vadd.f32 %v50_v14, %v49_v13 }
 0x142   :  { %v52_v16 = vrot.slane %v51_v15, 1 }
 0x144   :  { %v53_v17 = vadd.f32 %v52_v16, %v51_v15 }
 0x146   :  { %74 = vpush %v53_v17 }
 0x177   :  { %s75_s24 = spop %74 }
 0x178   :  { %v56_v18 = vstv %s75_s24 }
 0x179   :  { %58 = vst [vmem:[#allocation5] sm:$0xff] %v56_v18 }
 0x17a   :  { %113 = shalt.err (!%p110_p12)
}
 0x17b   :  { %s114_s27 = scalar_lea.hbm %s175_s2, 128 }
 0x17c   :  { %p115_p13 = scmp.ne.s32.totalorder %s175_s2, %s114_s27  ;;  %p118_p0 = scmp.lt.u32.totalorder %s114_s27, %s175_s2 }
 0x17e   :  { %p120_p1 = pnand %p118_p0, %p115_p13 }
 0x180   :  { %123 = shalt.err (!%p120_p1)
}
 0x181   :  { %68 = dma.vmem_to_hbm [thread:$0]  %s66_s23, 128, %s175_s2, [#allocation4]  }
 0x182   :  { %126 = dma.done.wait [#allocation4], 128  }
 0x183   :  { %127 = vsyncadd [#allocation4], 4294967168 }
 0x184   :  { %72 = vsyncpa [#allocation3], 1 }
 0x185   :  { %73 = vsyncpa [#allocation4], 1 }

</bundles_post_ra>
